<compile_context>
chip_gen: v5e
topology: v5e:2x2
jax: 0.10.0
libtpu: 0.0.40
codegen_flags: <defaults>
</compile_context>

<pallas_src>
import functools

import jax
import jax.numpy as jnp
from jax.experimental import pallas as pl
from jax.experimental.pallas import tpu as pltpu

_SUBLANE = 8  # sublane width (second-to-last dim of a vreg)


def _round_up(n, m):
    return ((n + m - 1) // m) * m


def _linear_relu_kernel(x_ref, w_ref, b_ref, o_ref):
    # One MXU matmul + VPU bias-add + relu.  Gridless; whole operands resident
    # in VMEM for the single invocation (no pipeline scaffolding).
    x = x_ref[...]                      # (Bp, K)  f32
    w = w_ref[...]                      # (K,  N)  f32
    b = b_ref[...]                      # (1,  N)  f32
    acc = jnp.dot(x, w, preferred_element_type=jnp.float32)
    o_ref[...] = jnp.maximum(acc + b, 0.0).astype(o_ref.dtype)


def init_params(key, in_feats, out_feats):
    """Build params once in the kernel's canonical layout.

    Matches nn.Linear's uniform(-1/sqrt(fan_in), +1/sqrt(fan_in)) init.
    Done once at model-init time, NOT per forward call.
    """
    kw, kb = jax.random.split(key)
    bound = 1.0 / (in_feats ** 0.5)
    weight = jax.random.uniform(kw, (out_feats, in_feats), jnp.float32,
                                minval=-bound, maxval=bound)   # PyTorch layout
    bias = jax.random.uniform(kb, (out_feats,), jnp.float32,
                              minval=-bound, maxval=bound)
    weight_t = jnp.asarray(weight.T)              # (in_feats, out_feats)
    bias2d = bias.reshape(1, out_feats)           # (1, out_feats)
    return weight_t, bias2d


def _linear_relu(x, weight_t, bias2d):
    B, K = x.shape
    N = weight_t.shape[1]

    # Only the batch (sublane) dim needs rounding; K/N are handled by Mosaic's
    # sub-tile layout for a full-array block.
    Bp = _round_up(B, _SUBLANE)
    x_p = x if Bp == B else jnp.pad(x, ((0, Bp - B), (0, 0)))

    cost = pl.CostEstimate(
        flops=2 * Bp * K * N,
        transcendentals=0,
        bytes_accessed=4 * (Bp * K + K * N + N + Bp * N),
    )

    out = pl.pallas_call(
        _linear_relu_kernel,
        out_shape=jax.ShapeDtypeStruct((Bp, N), jnp.float32),
        in_specs=[
            pl.BlockSpec(memory_space=pltpu.MemorySpace.VMEM),
            pl.BlockSpec(memory_space=pltpu.MemorySpace.VMEM),
            pl.BlockSpec(memory_space=pltpu.MemorySpace.VMEM),
        ],
        out_specs=pl.BlockSpec(memory_space=pltpu.MemorySpace.VMEM),
        cost_estimate=cost,
    )(x_p, weight_t, bias2d)

    return out if Bp == B else out[:B]

# TODO(synk): if B/K/N ever scale up, add a parallel batch grid (2 TCs on v7x,
# 64 MiB VMEM tile budget) and bf16 MXU operands on v6e/v7x.


@jax.jit
def test_dict_model_forward(x, weight_t, bias2d):
    # Reproduces TestDictModel.forward: return {'y': F.relu(self.linear(x))}
    # Single dispatch: pad (if any), pallas_call, and slice fuse under jit.
    return {"y": _linear_relu(x, weight_t, bias2d)}


if __name__ == "__main__":
    key = jax.random.PRNGKey(0)
    kx, kparams = jax.random.split(key)

    batch = 8
    in_feats = 32
    out_feats = 2   # NUM_CLASSES

    x = jax.random.normal(kx, (batch, in_feats), dtype=jnp.float32)

    # Params are padded/laid-out once here, outside the per-call path.
    weight_t, bias2d = init_params(kparams, in_feats, out_feats)

    out = test_dict_model_forward(x, weight_t, bias2d)
    y = jax.block_until_ready(out["y"])

    # Reference check in plain JAX.
    ref = jnp.maximum(x @ weight_t + bias2d, 0.0)
    assert y.shape == (batch, out_feats)
    assert jnp.allclose(y, ref, atol=1e-5, rtol=1e-5)

    print("KERNEL_OK")
</pallas_src>

<mosaic_0001>
module attributes {stable_mosaic.version = 11 : i64} {
  func.func @_linear_relu_kernel(%arg0: memref<8x32xf32, #tpu.memory_space<vmem>>, %arg1: memref<32x2xf32, #tpu.memory_space<vmem>>, %arg2: memref<1x2xf32, #tpu.memory_space<vmem>>, %arg3: memref<8x2xf32, #tpu.memory_space<vmem>>) attributes {dimension_semantics = [], scalar_prefetch = 0 : i64, scratch_operands = 0 : i64, tpu.core_type = #tpu.core_type<tc>} {
    %c0 = arith.constant 0 : index
    %c0_0 = arith.constant 0 : index
    %0 = vector.load %arg0[%c0, %c0_0] : memref<8x32xf32, #tpu.memory_space<vmem>>, vector<8x32xf32>
    %c0_1 = arith.constant 0 : index
    %c0_2 = arith.constant 0 : index
    %1 = vector.load %arg1[%c0_1, %c0_2] : memref<32x2xf32, #tpu.memory_space<vmem>>, vector<32x2xf32>
    %c0_3 = arith.constant 0 : index
    %c0_4 = arith.constant 0 : index
    %2 = vector.load %arg2[%c0_3, %c0_4] : memref<1x2xf32, #tpu.memory_space<vmem>>, vector<1x2xf32>
    %cst = arith.constant dense<0.000000e+00> : vector<8x2xf32>
    %3 = tpu.matmul %0, %1, %cst {dimension_numbers = #tpu.dot_dimension_numbers<[1], [0], [0], [1], [0, 0, 1, 1], [], []>} : vector<8x32xf32>, vector<32x2xf32>, vector<8x2xf32> -> vector<8x2xf32>
    %4 = vector.broadcast %2 : vector<1x2xf32> to vector<8x2xf32>
    %5 = arith.addf %3, %4 : vector<8x2xf32>
    %cst_5 = arith.constant 0.000000e+00 : f32
    %6 = vector.broadcast %cst_5 : f32 to vector<8x2xf32>
    %7 = arith.maximumf %5, %6 : vector<8x2xf32>
    %c0_6 = arith.constant 0 : index
    %c0_7 = arith.constant 0 : index
    %8 = vector.load %arg3[%c0_6, %c0_7] : memref<8x2xf32, #tpu.memory_space<vmem>>, vector<8x2xf32>
    tpu.vector_store %arg3[%c0_6, %c0_7], %7 {strides = array<i32>} : memref<8x2xf32, #tpu.memory_space<vmem>>, vector<8x2xf32>,
    return
  }
}

</mosaic_0001>

<bundles_post_ra>
// kernel: test_dict_model_forward.1
= control target key start
LH: loop header
LB: loop body
LE: loop exit
PB: predicated region body
PF: predicated region fallthrough
CT: control target
= control target key end

     0   :  { %vm23_vm0 = vcmask 261120   ;;  %vm48_vm1 = vcmask 15360   ;;  %s97_s1 = inlined_call_operand.vmem [shape: f32[32,2], index: 1, kind: input, shape index: {}]   ;;  %s98_s2 = inlined_call_operand.vmem [shape: f32[1,2], index: 2, kind: input, shape index: {}]   ;;  %s99_s0 = inlined_call_operand.vmem [shape: f32[8,32], index: 0, kind: input, shape index: {}]   ;;  %s100_s3 = inlined_call_operand.vmem [shape: f32[8,2], index: 3, kind: output, shape index: {}]  }
   0x1   :  { %v18_v0 = vld [vmem:[%s97_s1 + $0x18] sm:$0xff]  ;;  %v17_v1 = vld [vmem:[%s97_s1 + $0x10] sm:$0xff]  ;;  %v16_v2 = vld [vmem:[%s97_s1 + $0x8] sm:$0xff] }
   0x2   :  { %39 = vmatpush.msra.mxu0 %v18_v0  ;;  %v15_v3 = vld [vmem:[%s97_s1] sm:$0xff] }
   0x3   :  { %v14_v4 = vld [vmem:[%s99_s0] sm:$0xff] }
   0x4   :  { %40 = vmatpush.msra.mxu0 %v17_v1  ;;  %v55_v5 = vld [vmem:[%s98_s2] ss:$0 sm:$0xff] }
   0x6   :  { %41 = vmatpush.msra.mxu0 %v16_v2 }
   0x8   :  { %42 = vmatpush.msra.mxu0 %v15_v3 }
   0x9   :  { %54 = vmatmul.msk.f32.vlgmr.msra.gmra.mxu0 %vm23_vm0, %v14_v4 }
  0x86   :  { %v44_v6 = vpop.f32.mrf.mxu0 }
  0x87   :  { %v45_v7 = vadd.f32 %v55_v5, %v44_v6 }
  0x89   :  { %v47_v8 = vmax.f32 %v45_v7, 0.0 }
  0x8b   :  { %49 = vst.msk [vmem:[%s100_s3] sm:$0xff] %vm48_vm1, %v47_v8 }

</bundles_post_ra>
